<compile_context>
chip_gen: v7x
topology: tpu7x:2x2x1
jax: 0.10.0
libtpu: 0.0.40
codegen_flags: <defaults>
</compile_context>

<pallas_src>
import functools

import jax
import jax.numpy as jnp
from jax.experimental import pallas as pl
from jax.experimental.pallas import tpu as pltpu

_LANE = 128


def _channel_attention_kernel(x_ref, w1t_ref, w2t_ref, o_ref, sum_ref, max_ref,
                              *, hw_total, hw_tile, grid_hw, group_w,
                              defer_lane_reduce):
    # x_ref   : (n_tile, C, hw_tile)  streamed activation block (input dtype)
    # w1t_ref : (C, hidden)           fc1 weight^T (VMEM-resident)
    # w2t_ref : (hidden, C)           fc2 weight^T (VMEM-resident)
    # o_ref   : (n_tile, C)           sigmoid(fc(avg) + fc(max)); written at last k
    # sum_ref : f32 running sum   — (n_tile, C, group_w) if deferred else (n_tile, C)
    # max_ref : running max (input dtype), same shape family as sum_ref
    k = pl.program_id(1)
    n_tile = o_ref.shape[0]
    n_groups = hw_tile // group_w
    last = grid_hw - 1

    @pl.when(k == 0)
    def _init():
        sum_ref[...] = jnp.zeros(sum_ref.shape, sum_ref.dtype)
        max_ref[...] = jnp.full(max_ref.shape, -jnp.inf, max_ref.dtype)

    def group_vals(g, last_step):
        # Returns (sum-view f32, max-view input-dtype) for lane group g, or
        # None if the whole group lies in the padded tail (static decision).
        start = last * hw_tile + g * group_w
        if last_step and start >= hw_total:
            return None
        sl = x_ref[:, :, g * group_w:(g + 1) * group_w]
        s = sl.astype(jnp.float32)
        m = sl
        if last_step and (start + group_w > hw_total):
            # Only the straddling group pays for the mask.
            pos = (jax.lax.broadcasted_iota(jnp.int32, (1, 1, group_w), 2)
                   + start)
            valid = pos < hw_total
            s = jnp.where(valid, s, 0.0)
            m = jnp.where(valid, m, jnp.full(m.shape, -jnp.inf, m.dtype))
        return s, m

    def accumulate(last_step):
        s_acc = None
        m_acc = None
        for g in range(n_groups):
            vals = group_vals(g, last_step)
            if vals is None:
                break                              # later groups padded too
            s, m = vals
            if not defer_lane_reduce:
                # Fallback: reduce each group immediately (per-step XLU).
                s, m = jnp.sum(s, axis=-1), jnp.max(m, axis=-1)
            s_acc = s if s_acc is None else s_acc + s
            m_acc = m if m_acc is None else jnp.maximum(m_acc, m)
        sum_ref[...] += s_acc
        max_ref[...] = jnp.maximum(max_ref[...], m_acc)

    if hw_total % hw_tile == 0:
        # No padded tail: every step takes the unmasked path.
        accumulate(last_step=False)
    else:
        # Masking gated to the last HW step only.
        @pl.when(k < last)
        def _steady():
            accumulate(last_step=False)

        @pl.when(k == last)
        def _tail():
            accumulate(last_step=True)

    @pl.when(k == last)
    def _finalize():
        if defer_lane_reduce:
            # Single deferred cross-lane reduce of the lane partials.
            avg = jnp.sum(sum_ref[...], axis=-1) * (1.0 / hw_total)
            mx = jnp.max(max_ref[...], axis=-1).astype(jnp.float32)
        else:
            avg = sum_ref[...] * (1.0 / hw_total)
            mx = max_ref[...].astype(jnp.float32)
        # Stack once so one pair of tiny matmuls serves both poolings.
        pooled = jnp.concatenate([avg, mx], axis=0)             # (2*n_tile, C)
        w1t = w1t_ref[...].astype(jnp.float32)                  # (C, hidden)
        w2t = w2t_ref[...].astype(jnp.float32)                  # (hidden, C)
        h = jnp.maximum(
            jnp.dot(pooled, w1t, preferred_element_type=jnp.float32), 0.0)
        y = jnp.dot(h, w2t, preferred_element_type=jnp.float32)
        o_ref[...] = jax.nn.sigmoid(
            y[0:n_tile, :] + y[n_tile:2 * n_tile, :]).astype(o_ref.dtype)


def _vmem_budget_bytes():
    """~65% of physical VMEM: ~41 MiB on v7x (64 MiB), ~83 MiB on v5e/v6e
    (128 MiB); conservative 64 MiB-physical fallback if the query fails."""
    try:
        phys = int(pltpu.get_tpu_info().vmem_capacity_bytes)
    except Exception:
        phys = 64 << 20
    return int(max(24 << 20, min(phys * 0.65, 100 << 20)))


def channel_attention(x_nchw, w1, w2, *, n_tile=None, hw_tile=None):
    """CBAM ChannelAttention forward.

    x_nchw: (N, C, H, W); w1: (hidden, C, 1, 1); w2: (C, hidden, 1, 1).
    Returns sigmoid(fc(avg_pool(x)) + fc(max_pool(x))) with shape (N, C, 1, 1).
    """
    N, C, H, W = x_nchw.shape
    hidden = w1.shape[0]
    HW = H * W
    dt = x_nchw.dtype
    db = jnp.dtype(dt).itemsize

    x_flat = x_nchw.reshape(N, C, HW)          # keep HBM dtype (bf16 stays bf16)
    w1t = w1.reshape(hidden, C).T              # (C, hidden)
    w2t = w2.reshape(C, hidden).T              # (hidden, C)

    vmem_budget = _vmem_budget_bytes()
    # ~8 MiB x blocks where VMEM is plentiful (v5e/v6e), ~4 MiB on v7x.
    target_x_block = (8 << 20) if vmem_budget >= (64 << 20) else (4 << 20)

    # n_tile: full N when small (full-extent block dim is always legal); for
    # larger N a multiple of 8 giving >= 2 i-tiles so both v7x TCs get work.
    if n_tile is None:
        n_tile = N if N < 16 else max(8, min(32, ((N // 2) // 8) * 8))
    n_tile = min(n_tile, N)

    # hw_tile: sized by bytes, multiple of 128 (or full extent when HW < 128).
    if HW < _LANE:
        hw_tile = HW
    else:
        hw_max = (HW // _LANE) * _LANE
        if hw_tile is None:
            hw_tile = target_x_block // max(1, n_tile * C * db)
        hw_tile = max(_LANE, min((hw_tile // _LANE) * _LANE, hw_max))

    group_w = min(_LANE, hw_tile)
    grid = (pl.cdiv(N, n_tile), pl.cdiv(HW, hw_tile))

    # Lane-partial accumulators (deferred XLU reduce) unless they would be huge.
    wide_bytes = n_tile * C * group_w * (4 + db)
    defer_lane_reduce = wide_bytes <= (8 << 20)
    if defer_lane_reduce:
        scratch_shapes = [pltpu.VMEM((n_tile, C, group_w), jnp.float32),
                          pltpu.VMEM((n_tile, C, group_w), dt)]
    else:
        scratch_shapes = [pltpu.VMEM((n_tile, C), jnp.float32),
                          pltpu.VMEM((n_tile, C), dt)]

    kernel = functools.partial(
        _channel_attention_kernel,
        hw_total=HW, hw_tile=hw_tile, grid_hw=grid[1], group_w=group_w,
        defer_lane_reduce=defer_lane_reduce)

    out = pl.pallas_call(
        kernel,
        out_shape=jax.ShapeDtypeStruct((N, C), dt),
        grid_spec=pltpu.PrefetchScalarGridSpec(
            num_scalar_prefetch=0,
            grid=grid,
            in_specs=[
                # Streamed activation block.
                pl.BlockSpec((n_tile, C, hw_tile), lambda i, k: (i, 0, k)),
                # Tiny weights: constant index_map -> VMEM-resident.
                pl.BlockSpec((C, hidden), lambda i, k: (0, 0)),
                pl.BlockSpec((hidden, C), lambda i, k: (0, 0)),
            ],
            # Output block constant along k -> resident across the HW reduce.
            out_specs=pl.BlockSpec((n_tile, C), lambda i, k: (i, 0)),
            scratch_shapes=scratch_shapes,
        ),
        compiler_params=pltpu.CompilerParams(
            dimension_semantics=("parallel", "arbitrary"),
            vmem_limit_bytes=vmem_budget),
    )(x_flat, w1t, w2t)

    # NOTE: padded batch rows (N % n_tile != 0) carry garbage through the MLP
    # but land only in discarded output padding (benign).
    return out.reshape(N, C, 1, 1)


def _reference(x, w1, w2):
    xf = x.astype(jnp.float32)
    avg = jnp.mean(xf, axis=(2, 3))                         # (N, C)
    mx = jnp.max(xf, axis=(2, 3))                           # (N, C)
    w1m = w1.reshape(w1.shape[0], -1).astype(jnp.float32)   # (hidden, C)
    w2m = w2.reshape(w2.shape[0], -1).astype(jnp.float32)   # (C, hidden)

    def fc(v):
        return jnp.maximum(v @ w1m.T, 0.0) @ w2m.T

    y = jax.nn.sigmoid(fc(avg) + fc(mx))
    return y.reshape(x.shape[0], x.shape[1], 1, 1).astype(x.dtype)


if __name__ == "__main__":
    # ChannelAttention(in_planes=32, ratio=16) -> hidden = 2
    N, C, H, W = 2, 32, 16, 16
    ratio = 16
    hidden = C // ratio

    key = jax.random.PRNGKey(0)
    kx, kx2, k1, k2 = jax.random.split(key, 4)

    x = jax.random.normal(kx, (N, C, H, W), dtype=jnp.float32)
    # Conv2d(in, out, 1, bias=False) weight shapes.
    w1 = jax.random.normal(k1, (hidden, C, 1, 1), dtype=jnp.float32) * 0.1
    w2 = jax.random.normal(k2, (C, hidden, 1, 1), dtype=jnp.float32) * 0.1

    # 1) Auto-sized tiles (single HW step at this small shape).
    y = channel_attention(x, w1, w2)
    jax.block_until_ready(y)
    assert jnp.allclose(y, _reference(x, w1, w2), atol=1e-5, rtol=1e-5)

    # 2) Force hw_tile=128 to exercise the multi-step streamed reduction.
    y = channel_attention(x, w1, w2, hw_tile=128)
    jax.block_until_ready(y)
    assert jnp.allclose(y, _reference(x, w1, w2), atol=1e-5, rtol=1e-5)

    # 3) HW=144 with hw_tile=128 exercises the pl.when-gated masked tail step.
    x2 = jax.random.normal(kx2, (N, C, 12, 12), dtype=jnp.float32)
    y2 = channel_attention(x2, w1, w2, hw_tile=128)
    jax.block_until_ready(y2)
    assert jnp.allclose(y2, _reference(x2, w1, w2), atol=1e-5, rtol=1e-5)

    print("KERNEL_OK")
</pallas_src>

<mosaic_0001>
module attributes {stable_mosaic.version = 11 : i64} {
  func.func @_channel_attention_kernel(%arg0: i32, %arg1: i32, %arg2: memref<2x32x256xf32, #tpu.memory_space<vmem>>, %arg3: memref<32x2xf32, #tpu.memory_space<vmem>>, %arg4: memref<2x32xf32, #tpu.memory_space<vmem>>, %arg5: memref<2x32xf32, #tpu.memory_space<vmem>>, %arg6: memref<2x32x128xf32, #tpu.memory_space<vmem>>, %arg7: memref<2x32x128xf32, #tpu.memory_space<vmem>>) attributes {dimension_semantics = [#tpu.dimension_semantics<parallel>, #tpu.dimension_semantics<arbitrary>], iteration_bounds = array<i64: 1, 1>, scalar_prefetch = 0 : i64, scratch_operands = 2 : i64, tpu.core_type = #tpu.core_type<tc>, window_params = [{transform_indices = @transform_0, window_bounds = array<i64: 2, 32, 256>}, {pipeline_mode = #tpu.pipeline_mode<synchronous>, transform_indices = @transform_1, window_bounds = array<i64: 32, 2>}, {pipeline_mode = #tpu.pipeline_mode<synchronous>, transform_indices = @transform_2, window_bounds = array<i64: 2, 32>}, {transform_indices = @transform_3, window_bounds = array<i64: 2, 32>}]} {
    %c0_i32 = arith.constant 0 : i32
    %0 = arith.cmpi eq, %arg1, %c0_i32 : i32
    %1 = arith.extui %0 : i1 to i32
    %c0_i32_0 = arith.constant 0 : i32
    %2 = arith.cmpi ne, %1, %c0_i32_0 : i32
    scf.if %2 {
      %cst = arith.constant 0.000000e+00 : f32
      %16 = vector.broadcast %cst : f32 to vector<2x32x128xf32>
      %c0_19 = arith.constant 0 : index
      %c0_20 = arith.constant 0 : index
      %c0_21 = arith.constant 0 : index
      %17 = vector.load %arg6[%c0_19, %c0_20, %c0_21] : memref<2x32x128xf32, #tpu.memory_space<vmem>>, vector<2x32x128xf32>
      tpu.vector_store %arg6[%c0_19, %c0_20, %c0_21], %16 {strides = array<i32>} : memref<2x32x128xf32, #tpu.memory_space<vmem>>, vector<2x32x128xf32>,
      %cst_22 = arith.constant 0xFF800000 : f32
      %18 = vector.broadcast %cst_22 : f32 to vector<2x32x128xf32>
      %c0_23 = arith.constant 0 : index
      %c0_24 = arith.constant 0 : index
      %c0_25 = arith.constant 0 : index
      %19 = vector.load %arg7[%c0_23, %c0_24, %c0_25] : memref<2x32x128xf32, #tpu.memory_space<vmem>>, vector<2x32x128xf32>
      tpu.vector_store %arg7[%c0_23, %c0_24, %c0_25], %18 {strides = array<i32>} : memref<2x32x128xf32, #tpu.memory_space<vmem>>, vector<2x32x128xf32>,
    } else {
    }
    %c0 = arith.constant 0 : index
    %c0_1 = arith.constant 0 : index
    %c0_2 = arith.constant 0 : index
    %3 = vector.load %arg2[%c0, %c0_1, %c0_2] : memref<2x32x256xf32, #tpu.memory_space<vmem>>, vector<2x32x128xf32>
    %c0_3 = arith.constant 0 : index
    %c0_4 = arith.constant 0 : index
    %c128 = arith.constant 128 : index
    %4 = vector.load %arg2[%c0_3, %c0_4, %c128] : memref<2x32x256xf32, #tpu.memory_space<vmem>>, vector<2x32x128xf32>
    %5 = arith.addf %3, %4 : vector<2x32x128xf32>
    %6 = arith.maximumf %3, %4 : vector<2x32x128xf32>
    %c0_5 = arith.constant 0 : index
    %c0_6 = arith.constant 0 : index
    %c0_7 = arith.constant 0 : index
    %7 = vector.load %arg6[%c0_5, %c0_6, %c0_7] : memref<2x32x128xf32, #tpu.memory_space<vmem>>, vector<2x32x128xf32>
    %8 = arith.addf %7, %5 : vector<2x32x128xf32>
    %c0_8 = arith.constant 0 : index
    %c0_9 = arith.constant 0 : index
    %c0_10 = arith.constant 0 : index
    %9 = vector.load %arg6[%c0_8, %c0_9, %c0_10] : memref<2x32x128xf32, #tpu.memory_space<vmem>>, vector<2x32x128xf32>
    tpu.vector_store %arg6[%c0_8, %c0_9, %c0_10], %8 {strides = array<i32>} : memref<2x32x128xf32, #tpu.memory_space<vmem>>, vector<2x32x128xf32>,
    %c0_11 = arith.constant 0 : index
    %c0_12 = arith.constant 0 : index
    %c0_13 = arith.constant 0 : index
    %10 = vector.load %arg7[%c0_11, %c0_12, %c0_13] : memref<2x32x128xf32, #tpu.memory_space<vmem>>, vector<2x32x128xf32>
    %11 = arith.maximumf %10, %6 : vector<2x32x128xf32>
    %c0_14 = arith.constant 0 : index
    %c0_15 = arith.constant 0 : index
    %c0_16 = arith.constant 0 : index
    %12 = vector.load %arg7[%c0_14, %c0_15, %c0_16] : memref<2x32x128xf32, #tpu.memory_space<vmem>>, vector<2x32x128xf32>
    tpu.vector_store %arg7[%c0_14, %c0_15, %c0_16], %11 {strides = array<i32>} : memref<2x32x128xf32, #tpu.memory_space<vmem>>, vector<2x32x128xf32>,
    %c0_i32_17 = arith.constant 0 : i32
    %13 = arith.cmpi eq, %arg1, %c0_i32_17 : i32
    %14 = arith.extui %13 : i1 to i32
    %c0_i32_18 = arith.constant 0 : i32
    %15 = arith.cmpi ne, %14, %c0_i32_18 : i32
    scf.if %15 {
      %c0_19 = arith.constant 0 : index
      %c0_20 = arith.constant 0 : index
      %c0_21 = arith.constant 0 : index
      %16 = vector.load %arg6[%c0_19, %c0_20, %c0_21] : memref<2x32x128xf32, #tpu.memory_space<vmem>>, vector<2x32x128xf32>
      %cst = arith.constant dense<0.000000e+00> : vector<2x32xf32>
      %17 = vector.multi_reduction <add>, %16, %cst [2] : vector<2x32x128xf32> to vector<2x32xf32>
      %cst_22 = arith.constant 3.906250e-03 : f32
      %18 = vector.broadcast %cst_22 : f32 to vector<2x32xf32>
      %19 = arith.mulf %17, %18 : vector<2x32xf32>
      %c0_23 = arith.constant 0 : index
      %c0_24 = arith.constant 0 : index
      %c0_25 = arith.constant 0 : index
      %20 = vector.load %arg7[%c0_23, %c0_24, %c0_25] : memref<2x32x128xf32, #tpu.memory_space<vmem>>, vector<2x32x128xf32>
      %cst_26 = arith.constant dense<0xFF800000> : vector<2x32xf32>
      %21 = vector.multi_reduction <maximumf>, %20, %cst_26 [2] : vector<2x32x128xf32> to vector<2x32xf32>
      %22 = tpu.concatenate %19, %21 in 0 : vector<2x32xf32>, vector<2x32xf32> -> vector<4x32xf32>
      %c0_27 = arith.constant 0 : index
      %c0_28 = arith.constant 0 : index
      %23 = vector.load %arg3[%c0_27, %c0_28] : memref<32x2xf32, #tpu.memory_space<vmem>>, vector<32x2xf32>
      %c0_29 = arith.constant 0 : index
      %c0_30 = arith.constant 0 : index
      %24 = vector.load %arg4[%c0_29, %c0_30] : memref<2x32xf32, #tpu.memory_space<vmem>>, vector<2x32xf32>
      %cst_31 = arith.constant dense<0.000000e+00> : vector<4x2xf32>
      %25 = tpu.matmul %22, %23, %cst_31 {dimension_numbers = #tpu.dot_dimension_numbers<[1], [0], [0], [1], [0, 0, 1, 1], [], []>} : vector<4x32xf32>, vector<32x2xf32>, vector<4x2xf32> -> vector<4x2xf32>
      %cst_32 = arith.constant 0.000000e+00 : f32
      %26 = vector.broadcast %cst_32 : f32 to vector<4x2xf32>
      %27 = arith.maximumf %25, %26 : vector<4x2xf32>
      %cst_33 = arith.constant dense<0.000000e+00> : vector<4x32xf32>
      %28 = tpu.matmul %27, %24, %cst_33 {dimension_numbers = #tpu.dot_dimension_numbers<[1], [0], [0], [1], [0, 0, 1, 1], [], []>} : vector<4x2xf32>, vector<2x32xf32>, vector<4x32xf32> -> vector<4x32xf32>
      %29 = vector.extract_strided_slice %28 {offsets = [0, 0], sizes = [2, 32], strides = [1, 1]} : vector<4x32xf32> to vector<2x32xf32>
      %30 = vector.extract_strided_slice %28 {offsets = [2, 0], sizes = [2, 32], strides = [1, 1]} : vector<4x32xf32> to vector<2x32xf32>
      %31 = arith.addf %29, %30 : vector<2x32xf32>
      %32 = arith.negf %31 : vector<2x32xf32>
      %33 = math.exp %32 : vector<2x32xf32>
      %cst_34 = arith.constant 1.000000e+00 : f32
      %34 = vector.broadcast %cst_34 : f32 to vector<2x32xf32>
      %35 = arith.addf %34, %33 : vector<2x32xf32>
      %36 = arith.divf %34, %35 : vector<2x32xf32>
      %c0_35 = arith.constant 0 : index
      %c0_36 = arith.constant 0 : index
      %37 = vector.load %arg5[%c0_35, %c0_36] : memref<2x32xf32, #tpu.memory_space<vmem>>, vector<2x32xf32>
      tpu.vector_store %arg5[%c0_35, %c0_36], %36 {strides = array<i32>} : memref<2x32xf32, #tpu.memory_space<vmem>>, vector<2x32xf32>,
    } else {
    }
    return
  }
  func.func @transform_0(%arg0: i32, %arg1: i32) -> (i32, i32, i32) {
    %c0_i32 = arith.constant 0 : i32
    %c0_i32_0 = arith.constant 0 : i32
    return %arg0, %c0_i32, %arg1 : i32, i32, i32
  }
  func.func @transform_1(%arg0: i32, %arg1: i32) -> (i32, i32) {
    %c0_i32 = arith.constant 0 : i32
    %c0_i32_0 = arith.constant 0 : i32
    %c0_i32_1 = arith.constant 0 : i32
    return %c0_i32, %c0_i32_0 : i32, i32
  }
  func.func @transform_2(%arg0: i32, %arg1: i32) -> (i32, i32) {
    %c0_i32 = arith.constant 0 : i32
    %c0_i32_0 = arith.constant 0 : i32
    %c0_i32_1 = arith.constant 0 : i32
    return %c0_i32, %c0_i32_0 : i32, i32
  }
  func.func @transform_3(%arg0: i32, %arg1: i32) -> (i32, i32) {
    %c0_i32 = arith.constant 0 : i32
    %c0_i32_0 = arith.constant 0 : i32
    return %arg0, %c0_i32 : i32, i32
  }
}

</mosaic_0001>

<bundles_post_ra>
// kernel: tpu_custom_call.1
= control target key start
LH: loop header
LB: loop body
LE: loop exit
PB: predicated region body
PF: predicated region fallthrough
CT: control target
= control target key end

     0   :  { %8 = vsyncpa [#allocation5], 0  ;;  %s652_s0 = inlined_call_operand.hbm [shape: f32[2,32,256], index: 0, kind: input, shape index: {}]   ;;  %s653_s1 = inlined_call_operand.vmem [shape: f32[32,2], index: 1, kind: input, shape index: {}]   ;;  %s654_s2 = inlined_call_operand.vmem [shape: f32[2,32], index: 2, kind: input, shape index: {}]   ;;  %s655_s3 = inlined_call_operand.hbm [shape: f32[2,32], index: 3, kind: output, shape index: {}]  }
   0x1   :  { %9 = vsyncpa [#allocation6], 0  ;;  %s572_s12 = smov [#allocation4]   ;;  %s524_s16 = scalar_lea.hbm %s652_s0, 2048 }
   0x2   :  { %s15_s13 = sshll.u32 %s572_s12, 4  ;;  %p525_p0 = scmp.ne.s32.totalorder %s652_s0, %s524_s16  ;;  %s16_s13 = int_to_ptr.vmem [resolvable:$true] %s15_s13 }
   0x3   :  { %p528_p1 = scmp.lt.u32.totalorder %s524_s16, %s652_s0 }
   0x5   :  { %p530_p2 = pnand %p528_p1, %p525_p0 }
   0x7   :  { %533 = shalt.err (!%p530_p2)
}
   0x8   :  { %s534_s21 = scalar_lea.vmem %s16_s13, 2048  ;;  %p539_p4 = scmp.lt.s32.totalorder %s16_s13, %s16_s13 }
   0x9   :  { %p535_p3 = scmp.ne.s32.totalorder %s16_s13, %s534_s21  ;;  %p540_p5 = scmp.lt.s32.totalorder %s534_s21, %s534_s21 }
   0xb   :  { %p541_p6 = por %p540_p5, %p539_p4 }
   0xd   :  { %p542_p7 = pnand %p541_p6, %p535_p3 }
   0xf   :  { %545 = shalt.err (!%p542_p7)
}
  0x10   :  { %s573_s22 = smov 256   ;;  %s574_s23 = smov 16  }
  0x11   :  { %21 = dma.hbm_to_vmem [thread:$0]  %s652_s0, 2048, %s16_s13, [#allocation5], %s573_s22, %s573_s22, %s574_s23  }
  0x12   :  { %568 = dma.done.wait [#allocation5], 2048  }
  0x13   :  { %569 = vsyncadd [#allocation5], 4294965248  ;;  %v53_v0 = vld [vmem:[#allocation4 + $0x40] sm:$0xff]  ;;  %v61_v1 = vld [vmem:[#allocation4 + $0x48] sm:$0xff]  ;;  %v575_v35 = vmov 0.0|0.0   ;;  %vm576_vm0 = vmmov 0   ;;  %v196_v45 = vlaneseq }
  0x14   :  { %v49_v2 = vld [vmem:[#allocation4] sm:$0xff]  ;;  %v69_v3 = vadd.f32 %v61_v1, %v53_v0  ;;  %v57_v4 = vld [vmem:[#allocation4 + $0x8] sm:$0xff]  ;;  %v54_v5 = vld [vmem:[#allocation4 + $0x50] sm:$0xff]  ;;  %v77_v27 = vmax.f32 %v53_v0, %v61_v1  ;;  %507 = vmatprep.subr.bf16.mxu0 %v575_v35  ;;  %v577_v39 = vmov 0.0   ;;  %vm207_vm1 = vcmask 130112   ;;  %s578_s7 = smov [#allocation7]  }
  0x15   :  { %v62_v6 = vld [vmem:[#allocation4 + $0x58] sm:$0xff]  ;;  %v65_v7 = vadd.f32 %v57_v4, %v49_v2  ;;  %v50_v8 = vld [vmem:[#allocation4 + $0x10] sm:$0xff]  ;;  %v55_v12 = vld [vmem:[#allocation4 + $0x60] sm:$0xff]  ;;  %v73_v25 = vmax.f32 %v49_v2, %v57_v4  ;;  %499 = vmatprep.mubr.msk.f32.mxu0 %vm576_vm0, %v577_v39  ;;  %502 = vmatprep.subr.mxu1 %v577_v39  ;;  %v197_v48 = vand.u32 127, %v196_v45  ;;  %v199_v50 = vshrl.u32 %v196_v45, 7  ;;  %s471_s8 = sshll.u32 %s578_s7, 4  ;;  %s472_s8 = int_to_ptr.vmem [resolvable:$true] %s471_s8 }
  0x16   :  { %v58_v9 = vld [vmem:[#allocation4 + $0x18] sm:$0xff]  ;;  %148 = vadd.xlane.f32.xlu1 %v69_v3  ;;  %v70_v10 = vadd.f32 %v62_v6, %v54_v5  ;;  %v63_v13 = vld [vmem:[#allocation4 + $0x68] sm:$0xff]  ;;  %v51_v14 = vld [vmem:[#allocation4 + $0x20] sm:$0xff]  ;;  %v78_v26 = vmax.f32 %v54_v5, %v62_v6  ;;  %504 = vmatprep.mubr.msk.f32.mxu1 %vm576_vm0, %v577_v39  ;;  %vm214_vm2 = vcmask 195712   ;;  %vm221_vm3 = vcmask 261312   ;;  %p551_p9 = scmp.lt.s32.totalorder %s472_s8, %s472_s8 }
  0x17   :  { %140 = vadd.xlane.f32.xlu0 %v65_v7  ;;  %v66_v11 = vadd.f32 %v58_v9, %v50_v8  ;;  %v59_v15 = vld [vmem:[#allocation4 + $0x28] sm:$0xff]  ;;  %v71_v16 = vadd.f32 %v63_v13, %v55_v12  ;;  %v56_v18 = vld [vmem:[#allocation4 + $0x70] sm:$0xff]  ;;  %v64_v19 = vld [vmem:[#allocation4 + $0x78] sm:$0xff]  ;;  %v74_v24 = vmax.f32 %v50_v8, %v58_v9  ;;  %v79_v28 = vmax.f32 %v55_v12, %v63_v13 }
  0x18   :  { %v67_v17 = vadd.f32 %v59_v15, %v51_v14  ;;  %v52_v20 = vld [vmem:[#allocation4 + $0x30] sm:$0xff]  ;;  %v60_v21 = vld [vmem:[#allocation4 + $0x38] sm:$0xff]  ;;  %v72_v22 = vadd.f32 %v64_v19, %v56_v18  ;;  %v75_v29 = vmax.f32 %v51_v14, %v59_v15  ;;  %v80_v30 = vmax.f32 %v56_v18, %v64_v19  ;;  %v296_v32 = vld [vmem:[%s653_s1] sm:$0xff] }
  0x19   :  { %v68_v23 = vadd.f32 %v60_v21, %v52_v20  ;;  %v76_v31 = vmax.f32 %v52_v20, %v60_v21  ;;  %v297_v33 = vld [vmem:[%s653_s1 + $0x8] sm:$0xff]  ;;  %v298_v36 = vld [vmem:[%s653_s1 + $0x10] sm:$0xff]  ;;  %v299_v37 = vld [vmem:[%s653_s1 + $0x18] sm:$0xff]  ;;  %v202_v51 = vadd.s32 4294967288, %v197_v48  ;;  %v209_v52 = vadd.s32 4294967280, %v197_v48 }
  0x1a   :  { %150 = vadd.xlane.f32.xlu1 %v70_v10  ;;  %v508_v34 = vpack.c.bf16 %v297_v33, %v296_v32  ;;  %v511_v38 = vpack.c.bf16 %v299_v37, %v298_v36  ;;  %v216_v54 = vadd.s32 4294967272, %v197_v48  ;;  %v200_v56 = vsub.s32 %v197_v48, %v199_v50 }
  0x1b   :  { %142 = vadd.xlane.f32.xlu0 %v66_v11  ;;  %v205_v57 = vsub.s32 %v202_v51, %v199_v50  ;;  %v212_v59 = vsub.s32 %v209_v52, %v199_v50  ;;  %vm242_vm4 = vcmask 1041409   ;;  %vm291_vm5 = vcmask 1043459  }
  0x1c   :  { %509 = vmatpush3.bf16.msra.mxu0 %v508_v34  ;;  %v219_v2 = vsub.s32 %v216_v54, %v199_v50  ;;  %vm294_vm6 = vcmask 1041408   ;;  %vm301_vm7 = vcmask 261120   ;;  %vm376_vm8 = vcmask 15360  }
  0x1d   :  { %510 = vmatprep.subr.bf16.mxu0 %v575_v35  ;;  %vm463_vm9 = vcmask 254976  }
  0x1e   :  { %152 = vadd.xlane.f32.xlu1 %v71_v16 }
  0x1f   :  { %144 = vadd.xlane.f32.xlu0 %v67_v17 }
  0x20   :  { %512 = vmatpush3.bf16.msra.mxu0 %v511_v38 }
  0x22   :  { %154 = vadd.xlane.f32.xlu1 %v72_v22 }
  0x23   :  { %146 = vadd.xlane.f32.xlu0 %v68_v23 }
  0x26   :  { %174 = vmax.xlane.f32.xlu1 %v74_v24 }
  0x27   :  { %172 = vmax.xlane.f32.xlu0 %v73_v25 }
  0x2a   :  { %182 = vmax.xlane.f32.xlu1 %v78_v26 }
  0x2b   :  { %180 = vmax.xlane.f32.xlu0 %v77_v27 }
  0x2e   :  { %184 = vmax.xlane.f32.xlu1 %v79_v28 }
  0x2f   :  { %176 = vmax.xlane.f32.xlu0 %v75_v29 }
  0x32   :  { %186 = vmax.xlane.f32.xlu1 %v80_v30 }
  0x33   :  { %178 = vmax.xlane.f32.xlu0 %v76_v31 }
  0xa3   :  { %v149_v40 = vpop.xlane.xlu1 %148 }
  0xa4   :  { %v141_v41 = vpop.xlane.xlu0 %140  ;;  %v160_v60 = vmul.f32 0.00390625, %v149_v40 }
  0xa5   :  { %v156_v61 = vmul.f32 0.00390625, %v141_v41  ;;  %v300_v41 = vld [vmem:[%s654_s2] sm:$0x3]  ;;  %s546_s2 = scalar_lea.vmem %s472_s8, 32 }
  0xa6   :  { %v226_v7 = vrot.slane %v160_v60, %v200_v56  ;;  %503 = vmatpush3.msk.msra.mxu1 %vm294_vm6, %v300_v41  ;;  %p547_p8 = scmp.ne.s32.totalorder %s472_s8, %s546_s2  ;;  %p552_p10 = scmp.lt.s32.totalorder %s546_s2, %s546_s2 }
  0xa7   :  { %v151_v42 = vpop.xlane.xlu1 %150  ;;  %v201_v8 = vrot.slane %v156_v61, %v200_v56 }
  0xa8   :  { %v143_v43 = vpop.xlane.xlu0 %142  ;;  %v161_v58 = vmul.f32 0.00390625, %v151_v42  ;;  %p553_p11 = por %p552_p10, %p551_p9 }
  0xa9   :  { %v157_v62 = vmul.f32 0.00390625, %v143_v43 }
  0xaa   :  { %v230_v6 = vrot.slane %v161_v58, %v205_v57  ;;  %p554_p12 = pnand %p553_p11, %p547_p8 }
  0xab   :  { %v153_v44 = vpop.xlane.xlu1 %152  ;;  %v206_v9 = vrot.slane %v157_v62, %v205_v57 }
  0xac   :  { %v145_v46 = vpop.xlane.xlu0 %144  ;;  %v162_v63 = vmul.f32 0.00390625, %v153_v44  ;;  %v231_v21 = vsel %vm207_vm1, %v230_v6, %v226_v7 }
  0xad   :  { %v158_v1 = vmul.f32 0.00390625, %v145_v46  ;;  %v208_v23 = vsel %vm207_vm1, %v206_v9, %v201_v8 }
  0xae   :  { %v235_v10 = vrot.slane %v162_v63, %v212_v59 }
  0xaf   :  { %v155_v47 = vpop.xlane.xlu1 %154  ;;  %v213_v12 = vrot.slane %v158_v1, %v212_v59 }
  0xb0   :  { %v147_v49 = vpop.xlane.xlu0 %146  ;;  %v163_v3 = vmul.f32 0.00390625, %v155_v47  ;;  %v236_v24 = vsel %vm214_vm2, %v235_v10, %v231_v21 }
  0xb1   :  { %v159_v5 = vmul.f32 0.00390625, %v147_v49  ;;  %v215_v26 = vsel %vm214_vm2, %v213_v12, %v208_v23 }
  0xb2   :  { %v240_v13 = vrot.slane %v163_v3, %v219_v2 }
  0xb3   :  { %v175_v53 = vpop.xlane.xlu1 %174  ;;  %v220_v17 = vrot.slane %v159_v5, %v219_v2 }
  0xb4   :  { %v173_v55 = vpop.xlane.xlu0 %172  ;;  %v260_v18 = vrot.slane %v175_v53, %v205_v57  ;;  %v241_v27 = vsel %vm221_vm3, %v240_v13, %v236_v24 }
  0xb5   :  { %v256_v19 = vrot.slane %v173_v55, %v200_v56  ;;  %v222_v31 = vsel %vm221_vm3, %v220_v17, %v215_v26 }
  0xb6   :  { %v243_v38 = vsel %vm242_vm4, %v241_v27, %v222_v31 }
  0xb7   :  { %v183_v0 = vpop.xlane.xlu1 %182  ;;  %v261_v32 = vsel %vm207_vm1, %v260_v18, %v256_v19 }
  0xb8   :  { %v181_v4 = vpop.xlane.xlu0 %180  ;;  %v279_v14 = vrot.slane %v183_v0, %v205_v57 }
  0xb9   :  { %v275_v15 = vrot.slane %v181_v4, %v200_v56 }
  0xbb   :  { %v185_v11 = vpop.xlane.xlu1 %184  ;;  %v280_v28 = vsel %vm207_vm1, %v279_v14, %v275_v15 }
  0xbc   :  { %v177_v16 = vpop.xlane.xlu0 %176  ;;  %v284_v20 = vrot.slane %v185_v11, %v212_v59 }
  0xbd   :  { %v265_v22 = vrot.slane %v177_v16, %v212_v59 }
  0xbe   :  { %v285_v33 = vsel %vm214_vm2, %v284_v20, %v280_v28 }
  0xbf   :  { %v187_v25 = vpop.xlane.xlu1 %186  ;;  %v266_v35 = vsel %vm214_vm2, %v265_v22, %v261_v32 }
  0xc0   :  { %v289_v29 = vrot.slane %v187_v25, %v219_v2  ;;  %v179_v30 = vpop.xlane.xlu0 %178 }
  0xc1   :  { %v270_v34 = vrot.slane %v179_v30, %v219_v2 }
  0xc2   :  { %v290_v36 = vsel %vm221_vm3, %v289_v29, %v285_v33 }
  0xc3   :  { %v271_v37 = vsel %vm221_vm3, %v270_v34, %v266_v35 }
  0xc4   :  { %v292_v39 = vsel %vm291_vm5, %v290_v36, %v271_v37 }
  0xc5   :  { %v295_v40 = vsel %vm294_vm6, %v243_v38, %v292_v39 }
  0xc6   :  { %500 = vmatmul.mubr.msk.f32.vlgmr.msra.gmra.mrb[0].mxu0 %vm301_vm7, %v295_v40 }
 0x199   :  { %v371_v42 = vpop.f32.mrb[0].mxu0 }
 0x19a   :  { %v375_v43 = vmax.f32 %v371_v42, 0.0  ;;  %v501_v44 = vpop.f32.mrb[1].mxu0 }
 0x19c   :  { %505 = vmatmul.mubr.msk.f32.vlgmr.msra.gmra.mrb[0].mxu1 %vm376_vm8, %v375_v43 }
 0x26f   :  { %v449_v45 = vpop.f32.mrb[0].mxu1 }
 0x270   :  { %v454_v46 = vrot.slane %v449_v45, 2  ;;  %v506_v47 = vpop.f32.mrb[1].mxu1 }
 0x272   :  { %v456_v48 = vadd.f32 %v454_v46, %v449_v45 }
 0x274   :  { %v483_v49 = vmul.f32 -1.442695, %v456_v48 }
 0x276   :  { %520 = vpow2.f32 %v483_v49 }
 0x280   :  { %v521_v50 = vpop.eup %520 }
 0x281   :  { %v460_v51 = vadd.f32 1.0, %v521_v50 }
 0x283   :  { %522 = vrcp.f32 %v460_v51 }
 0x28d   :  { %v523_v52 = vpop.eup %522 }
 0x28e   :  { %464 = vst.msk [vmem:[#allocation7] sm:$0x3] %vm463_vm9, %v523_v52 }
 0x28f   :  { %557 = shalt.err (!%p554_p12)
}
 0x290   :  { %s558_s11 = scalar_lea.hbm %s655_s3, 32 }
 0x291   :  { %p559_p13 = scmp.ne.s32.totalorder %s655_s3, %s558_s11  ;;  %p562_p0 = scmp.lt.u32.totalorder %s558_s11, %s655_s3 }
 0x293   :  { %p564_p1 = pnand %p562_p0, %p559_p13 }
 0x295   :  { %567 = shalt.err (!%p564_p1)
}
 0x296   :  { %474 = dma.vmem_to_hbm [thread:$0]  %s472_s8, 32, %s655_s3, [#allocation6]  }
 0x297   :  { %570 = dma.done.wait [#allocation6], 32  }
 0x298   :  { %571 = vsyncadd [#allocation6], 4294967264 }
 0x299   :  { %478 = vsyncpa [#allocation5], 1 }
 0x29a   :  { %479 = vsyncpa [#allocation6], 1 }

</bundles_post_ra>
